<compile_context>
chip_gen: v6e
topology: v6e:2x2x1
jax: 0.10.0
libtpu: 0.0.40
codegen_flags: <defaults>
</compile_context>

<pallas_src>
import jax
import jax.numpy as jnp
from jax.experimental import pallas as pl
from jax.experimental.pallas import tpu as pltpu


def _round_up(x, m):
    return ((x + m - 1) // m) * m


# ----------------------------------------------------------------------------
# Kernels
# ----------------------------------------------------------------------------
def _prediction_kernel_stacked(a_ref, b_ref, w1s_ref, b1_ref, w2_ref, b2_ref,
                               out_ref, feats_ref):
    """Layer 1 as a single K=3*Hp matmul over [a | b | a*b] built in VMEM."""
    H = a_ref.shape[1]           # true hidden size (may be < Hp)
    Hp = w2_ref.shape[0]         # lane-padded hidden size
    blk = a_ref.shape[0]

    a = a_ref[...]
    b = b_ref[...]
    ab = a * b                   # VPU; overlaps MXU work

    # Lane-offset stores: feats = [a | 0 | b | 0 | a*b | 0], segments Hp wide.
    feats_ref[:, 0:H] = a
    feats_ref[:, Hp:Hp + H] = b
    feats_ref[:, 2 * Hp:2 * Hp + H] = ab
    if H != Hp:                  # zero the pad lanes every step (megacore-safe)
        z = jnp.zeros((blk, Hp - H), dtype=a.dtype)
        feats_ref[:, H:Hp] = z
        feats_ref[:, Hp + H:2 * Hp] = z
        feats_ref[:, 2 * Hp + H:3 * Hp] = z

    h = jnp.dot(feats_ref[...], w1s_ref[...], preferred_element_type=jnp.float32)
    h = jnp.maximum(h + b1_ref[...].astype(jnp.float32), 0.0)

    out = jnp.dot(h.astype(w2_ref.dtype), w2_ref[...],
                  preferred_element_type=jnp.float32)
    out_ref[...] = (out + b2_ref[...].astype(jnp.float32)).astype(out_ref.dtype)


def _prediction_kernel_3mm(a_ref, b_ref, w1a_ref, w1b_ref, w1c_ref, b1_ref,
                           w2_ref, b2_ref, out_ref):
    """Three-matmul form (large H / v5e)."""
    a = a_ref[...]
    b = b_ref[...]
    ab = a * b

    h = jnp.dot(a, w1a_ref[...], preferred_element_type=jnp.float32)
    h = h + jnp.dot(b, w1b_ref[...], preferred_element_type=jnp.float32)
    h = h + jnp.dot(ab, w1c_ref[...], preferred_element_type=jnp.float32)
    h = jnp.maximum(h + b1_ref[...].astype(jnp.float32), 0.0)

    out = jnp.dot(h.astype(w2_ref.dtype), w2_ref[...],
                  preferred_element_type=jnp.float32)
    out_ref[...] = (out + b2_ref[...].astype(jnp.float32)).astype(out_ref.dtype)


# ----------------------------------------------------------------------------
# One-time parameter preparation (fold + pad). Call once at init.
# ----------------------------------------------------------------------------
def prepare_prediction_params(w1, b1, w2, b2, *, stacked=None):
    """w1: [4H, H] (stored as in_features x out_features), b1: [H],
    w2: [H, C], b2: [C]. Returns pre-folded, pre-padded device arrays."""
    H = w1.shape[1]
    C = w2.shape[1]
    assert w1.shape[0] == 4 * H and w2.shape[0] == H and b1.shape[0] == H

    Hp = _round_up(H, 128)
    Cp = _round_up(C, 128)
    if stacked is None:
        stacked = Hp <= 256      # single wide-K matmul pays off at small H

    wdt = w1.dtype
    # Fold in f32 (avoids an extra bf16 rounding step), cast back to storage dtype.
    w1f = w1.astype(jnp.float32)
    w1a = (w1f[0 * H:1 * H] + w1f[3 * H:4 * H]).astype(wdt)
    w1b = (w1f[1 * H:2 * H] - w1f[3 * H:4 * H]).astype(wdt)
    w1c = w1f[2 * H:3 * H].astype(wdt)

    def padrc(x, r, c):
        return jnp.pad(x, ((0, r - x.shape[0]), (0, c - x.shape[1])))

    params = {
        "H": H, "C": C, "Hp": Hp, "Cp": Cp, "stacked": bool(stacked),
        "b1": padrc(b1.reshape(1, H), 1, Hp),
        "w2": padrc(w2, Hp, Cp),
        "b2": padrc(b2.reshape(1, C), 1, Cp),
    }
    if stacked:
        params["w1s"] = jnp.concatenate(
            [padrc(w1a, Hp, Hp), padrc(w1b, Hp, Hp), padrc(w1c, Hp, Hp)], axis=0)
    else:
        # Keep K unpadded (rows = H); only the output dim is lane-padded.
        params["w1a"] = padrc(w1a, H, Hp)
        params["w1b"] = padrc(w1b, H, Hp)
        params["w1c"] = padrc(w1c, H, Hp)
    return params


# ----------------------------------------------------------------------------
# Forward
# ----------------------------------------------------------------------------
def prediction_forward(a_feature, b_feature, params, *, block_b=None):
    """a_feature, b_feature: [B, H]. Returns [B, C] in the input dtype."""
    B, H = a_feature.shape
    assert H == params["H"]
    Hp, Cp, C = params["Hp"], params["Cp"], params["C"]
    dtype = a_feature.dtype

    # Batch tiling: aim for >=2 grid steps (v7x megacore), cap tile at 256 rows.
    if block_b is None:
        block_b = max(8, min(256, _round_up(pl.cdiv(B, 2), 8)))
    block_b = max(8, _round_up(block_b, 8))
    Bp = _round_up(B, block_b)

    # Pad only a ragged batch remainder; never re-pad activations along H.
    if Bp != B:
        a_in = jnp.pad(a_feature, ((0, Bp - B), (0, 0)))
        b_in = jnp.pad(b_feature, ((0, Bp - B), (0, 0)))
    else:
        a_in, b_in = a_feature, b_feature

    grid = (Bp // block_b,)

    # Explicit VMEM budget (weights single-buffered, activations double-buffered).
    act_isz = jnp.dtype(dtype).itemsize
    w_isz = jnp.dtype(params["w2"].dtype).itemsize
    if params["stacked"]:
        w_bytes = (3 * Hp * Hp + Hp * Cp + Hp + Cp) * w_isz
        scratch_bytes = block_b * 3 * Hp * act_isz
    else:
        w_bytes = (3 * H * Hp + Hp * Cp + Hp + Cp) * w_isz
        scratch_bytes = 0
    act_bytes = 2 * 2 * block_b * H * act_isz
    out_bytes = 2 * block_b * Cp * act_isz
    f32_tmp = block_b * (Hp + Cp) * 4
    footprint = w_bytes + act_bytes + out_bytes + scratch_bytes + f32_tmp
    try:
        vmem_cap = int(pltpu.get_tpu_info().vmem_capacity_bytes)
    except Exception:
        vmem_cap = 64 << 20
    vmem_limit = min(max(int(1.5 * footprint) + (2 << 20), 16 << 20),
                     int(0.9 * vmem_cap))

    def run(single_buffer_weights):
        wkw = ({"pipeline_mode": pl.Buffered(1)} if single_buffer_weights else {})
        if params["stacked"]:
            kernel = _prediction_kernel_stacked
            weight_args = (params["w1s"],)
            weight_specs = [pl.BlockSpec((3 * Hp, Hp), lambda i: (0, 0), **wkw)]
            scratch_shapes = [pltpu.VMEM((block_b, 3 * Hp), dtype)]
        else:
            kernel = _prediction_kernel_3mm
            weight_args = (params["w1a"], params["w1b"], params["w1c"])
            weight_specs = [pl.BlockSpec((H, Hp), lambda i: (0, 0), **wkw)] * 3
            scratch_shapes = []

        in_specs = (
            [pl.BlockSpec((block_b, H), lambda i: (i, 0)),   # a tile
             pl.BlockSpec((block_b, H), lambda i: (i, 0))]   # b tile
            + weight_specs                                   # resident W1*
            + [pl.BlockSpec((1, Hp), lambda i: (0, 0), **wkw),    # b1
               pl.BlockSpec((Hp, Cp), lambda i: (0, 0), **wkw),   # W2 (resident)
               pl.BlockSpec((1, Cp), lambda i: (0, 0), **wkw)]    # b2
        )

        return pl.pallas_call(
            kernel,
            out_shape=jax.ShapeDtypeStruct((Bp, Cp), dtype),
            grid_spec=pltpu.PrefetchScalarGridSpec(
                num_scalar_prefetch=0,
                grid=grid,
                in_specs=in_specs,
                out_specs=pl.BlockSpec((block_b, Cp), lambda i: (i, 0)),
                scratch_shapes=scratch_shapes,
            ),
            compiler_params=pltpu.CompilerParams(
                dimension_semantics=("parallel",),
                vmem_limit_bytes=int(vmem_limit),
            ),
        )(a_in, b_in, *weight_args, params["b1"], params["w2"], params["b2"])

    try:
        out_p = run(True)
    except Exception:
        # Fallback if pl.Buffered(1) is not supported by this JAX build.
        out_p = run(False)

    return out_p[:B, :C]


def prediction_reference(a, b, w1, b1, w2, b2):
    feats = jnp.concatenate([a, b, a * b, a - b], axis=-1)
    h = jnp.maximum(feats @ w1 + b1, 0.0)
    return h @ w2 + b2


if __name__ == "__main__":
    # Small shapes consistent with the module: batch=8, hidden=32, num_classes=4.
    B, H, C = 8, 32, 4
    key = jax.random.PRNGKey(0)
    k_a, k_b, k_w1, k_b1, k_w2, k_b2 = jax.random.split(key, 6)

    a_feature = jax.random.normal(k_a, (B, H), dtype=jnp.float32)
    b_feature = jax.random.normal(k_b, (B, H), dtype=jnp.float32)

    # Linear weights stored pre-transposed as (in_features, out_features).
    w1 = jax.random.normal(k_w1, (4 * H, H), dtype=jnp.float32) * 0.05
    b1 = jax.random.normal(k_b1, (H,), dtype=jnp.float32) * 0.01
    w2 = jax.random.normal(k_w2, (H, C), dtype=jnp.float32) * 0.05
    b2 = jax.random.normal(k_b2, (C,), dtype=jnp.float32) * 0.01

    ref = prediction_reference(a_feature, b_feature, w1, b1, w2, b2)

    # TODO(synk): dropout1/dropout2 are identity at inference and are not modeled.

    # One-time init (fold + pad); forward never re-touches the weights in HBM.
    params = prepare_prediction_params(w1, b1, w2, b2)           # stacked path
    out = prediction_forward(a_feature, b_feature, params)
    out = jax.block_until_ready(out)
    assert out.shape == (B, C)
    assert jnp.allclose(out, ref, atol=1e-4, rtol=1e-4), "stacked path mismatch"

    # Also validate the large-H (3-matmul) fallback path at the same shapes.
    params_3mm = prepare_prediction_params(w1, b1, w2, b2, stacked=False)
    out2 = prediction_forward(a_feature, b_feature, params_3mm)
    out2 = jax.block_until_ready(out2)
    assert jnp.allclose(out2, ref, atol=1e-4, rtol=1e-4), "3mm path mismatch"

    print("KERNEL_OK")
</pallas_src>

<mosaic_0001>
module attributes {stable_mosaic.version = 11 : i64} {
  func.func @_prediction_kernel_stacked(%arg0: i32, %arg1: memref<8x32xf32, #tpu.memory_space<vmem>>, %arg2: memref<8x32xf32, #tpu.memory_space<vmem>>, %arg3: memref<384x128xf32, #tpu.memory_space<vmem>>, %arg4: memref<1x128xf32, #tpu.memory_space<vmem>>, %arg5: memref<128x128xf32, #tpu.memory_space<vmem>>, %arg6: memref<1x128xf32, #tpu.memory_space<vmem>>, %arg7: memref<8x128xf32, #tpu.memory_space<vmem>>, %arg8: memref<8x384xf32, #tpu.memory_space<vmem>>) attributes {dimension_semantics = [#tpu.dimension_semantics<parallel>], iteration_bounds = array<i64: 1>, scalar_prefetch = 0 : i64, scratch_operands = 1 : i64, tpu.core_type = #tpu.core_type<tc>, window_params = [{transform_indices = @transform_0, window_bounds = array<i64: 8, 32>}, {transform_indices = @transform_1, window_bounds = array<i64: 8, 32>}, {pipeline_mode = #tpu.pipeline_mode<synchronous>, transform_indices = @transform_2, window_bounds = array<i64: 384, 128>}, {pipeline_mode = #tpu.pipeline_mode<synchronous>, transform_indices = @transform_3, window_bounds = array<i64: 1, 128>}, {pipeline_mode = #tpu.pipeline_mode<synchronous>, transform_indices = @transform_4, window_bounds = array<i64: 128, 128>}, {pipeline_mode = #tpu.pipeline_mode<synchronous>, transform_indices = @transform_5, window_bounds = array<i64: 1, 128>}, {transform_indices = @transform_6, window_bounds = array<i64: 8, 128>}]} {
    %c0 = arith.constant 0 : index
    %c0_0 = arith.constant 0 : index
    %0 = vector.load %arg1[%c0, %c0_0] : memref<8x32xf32, #tpu.memory_space<vmem>>, vector<8x32xf32>
    %c0_1 = arith.constant 0 : index
    %c0_2 = arith.constant 0 : index
    %1 = vector.load %arg2[%c0_1, %c0_2] : memref<8x32xf32, #tpu.memory_space<vmem>>, vector<8x32xf32>
    %2 = arith.mulf %0, %1 : vector<8x32xf32>
    %c0_3 = arith.constant 0 : index
    %c0_4 = arith.constant 0 : index
    %3 = vector.load %arg8[%c0_3, %c0_4] : memref<8x384xf32, #tpu.memory_space<vmem>>, vector<8x32xf32>
    tpu.vector_store %arg8[%c0_3, %c0_4], %0 {strides = array<i32>} : memref<8x384xf32, #tpu.memory_space<vmem>>, vector<8x32xf32>,
    %c0_5 = arith.constant 0 : index
    %c128 = arith.constant 128 : index
    %4 = vector.load %arg8[%c0_5, %c128] : memref<8x384xf32, #tpu.memory_space<vmem>>, vector<8x32xf32>
    tpu.vector_store %arg8[%c0_5, %c128], %1 {strides = array<i32>} : memref<8x384xf32, #tpu.memory_space<vmem>>, vector<8x32xf32>,
    %c0_6 = arith.constant 0 : index
    %c256 = arith.constant 256 : index
    %5 = vector.load %arg8[%c0_6, %c256] : memref<8x384xf32, #tpu.memory_space<vmem>>, vector<8x32xf32>
    tpu.vector_store %arg8[%c0_6, %c256], %2 {strides = array<i32>} : memref<8x384xf32, #tpu.memory_space<vmem>>, vector<8x32xf32>,
    %cst = arith.constant 0.000000e+00 : f32
    %6 = vector.broadcast %cst : f32 to vector<8x96xf32>
    %c0_7 = arith.constant 0 : index
    %c32 = arith.constant 32 : index
    %7 = vector.load %arg8[%c0_7, %c32] : memref<8x384xf32, #tpu.memory_space<vmem>>, vector<8x96xf32>
    tpu.vector_store %arg8[%c0_7, %c32], %6 {strides = array<i32>} : memref<8x384xf32, #tpu.memory_space<vmem>>, vector<8x96xf32>,
    %c0_8 = arith.constant 0 : index
    %c160 = arith.constant 160 : index
    %8 = vector.load %arg8[%c0_8, %c160] : memref<8x384xf32, #tpu.memory_space<vmem>>, vector<8x96xf32>
    tpu.vector_store %arg8[%c0_8, %c160], %6 {strides = array<i32>} : memref<8x384xf32, #tpu.memory_space<vmem>>, vector<8x96xf32>,
    %c0_9 = arith.constant 0 : index
    %c288 = arith.constant 288 : index
    %9 = vector.load %arg8[%c0_9, %c288] : memref<8x384xf32, #tpu.memory_space<vmem>>, vector<8x96xf32>
    tpu.vector_store %arg8[%c0_9, %c288], %6 {strides = array<i32>} : memref<8x384xf32, #tpu.memory_space<vmem>>, vector<8x96xf32>,
    %c0_10 = arith.constant 0 : index
    %c0_11 = arith.constant 0 : index
    %10 = vector.load %arg8[%c0_10, %c0_11] : memref<8x384xf32, #tpu.memory_space<vmem>>, vector<8x384xf32>
    %c0_12 = arith.constant 0 : index
    %c0_13 = arith.constant 0 : index
    %11 = vector.load %arg3[%c0_12, %c0_13] : memref<384x128xf32, #tpu.memory_space<vmem>>, vector<384x128xf32>
    %cst_14 = arith.constant dense<0.000000e+00> : vector<8x128xf32>
    %12 = tpu.matmul %10, %11, %cst_14 {dimension_numbers = #tpu.dot_dimension_numbers<[1], [0], [0], [1], [0, 0, 1, 1], [], []>} : vector<8x384xf32>, vector<384x128xf32>, vector<8x128xf32> -> vector<8x128xf32>
    %c0_15 = arith.constant 0 : index
    %c0_16 = arith.constant 0 : index
    %13 = vector.load %arg4[%c0_15, %c0_16] : memref<1x128xf32, #tpu.memory_space<vmem>>, vector<1x128xf32>
    %14 = vector.broadcast %13 : vector<1x128xf32> to vector<8x128xf32>
    %15 = arith.addf %12, %14 : vector<8x128xf32>
    %cst_17 = arith.constant 0.000000e+00 : f32
    %16 = vector.broadcast %cst_17 : f32 to vector<8x128xf32>
    %17 = arith.maximumf %15, %16 : vector<8x128xf32>
    %c0_18 = arith.constant 0 : index
    %c0_19 = arith.constant 0 : index
    %18 = vector.load %arg5[%c0_18, %c0_19] : memref<128x128xf32, #tpu.memory_space<vmem>>, vector<128x128xf32>
    %cst_20 = arith.constant dense<0.000000e+00> : vector<8x128xf32>
    %19 = tpu.matmul %17, %18, %cst_20 {dimension_numbers = #tpu.dot_dimension_numbers<[1], [0], [0], [1], [0, 0, 1, 1], [], []>} : vector<8x128xf32>, vector<128x128xf32>, vector<8x128xf32> -> vector<8x128xf32>
    %c0_21 = arith.constant 0 : index
    %c0_22 = arith.constant 0 : index
    %20 = vector.load %arg6[%c0_21, %c0_22] : memref<1x128xf32, #tpu.memory_space<vmem>>, vector<1x128xf32>
    %21 = vector.broadcast %20 : vector<1x128xf32> to vector<8x128xf32>
    %22 = arith.addf %19, %21 : vector<8x128xf32>
    %c0_23 = arith.constant 0 : index
    %c0_24 = arith.constant 0 : index
    %23 = vector.load %arg7[%c0_23, %c0_24] : memref<8x128xf32, #tpu.memory_space<vmem>>, vector<8x128xf32>
    tpu.vector_store %arg7[%c0_23, %c0_24], %22 {strides = array<i32>} : memref<8x128xf32, #tpu.memory_space<vmem>>, vector<8x128xf32>,
    return
  }
  func.func @transform_0(%arg0: i32) -> (i32, i32) {
    %c0_i32 = arith.constant 0 : i32
    %c0_i32_0 = arith.constant 0 : i32
    return %arg0, %c0_i32 : i32, i32
  }
  func.func @transform_1(%arg0: i32) -> (i32, i32) {
    %c0_i32 = arith.constant 0 : i32
    %c0_i32_0 = arith.constant 0 : i32
    return %arg0, %c0_i32 : i32, i32
  }
  func.func @transform_2(%arg0: i32) -> (i32, i32) {
    %c0_i32 = arith.constant 0 : i32
    %c0_i32_0 = arith.constant 0 : i32
    %c0_i32_1 = arith.constant 0 : i32
    return %c0_i32, %c0_i32_0 : i32, i32
  }
  func.func @transform_3(%arg0: i32) -> (i32, i32) {
    %c0_i32 = arith.constant 0 : i32
    %c0_i32_0 = arith.constant 0 : i32
    %c0_i32_1 = arith.constant 0 : i32
    return %c0_i32, %c0_i32_0 : i32, i32
  }
  func.func @transform_4(%arg0: i32) -> (i32, i32) {
    %c0_i32 = arith.constant 0 : i32
    %c0_i32_0 = arith.constant 0 : i32
    %c0_i32_1 = arith.constant 0 : i32
    return %c0_i32, %c0_i32_0 : i32, i32
  }
  func.func @transform_5(%arg0: i32) -> (i32, i32) {
    %c0_i32 = arith.constant 0 : i32
    %c0_i32_0 = arith.constant 0 : i32
    %c0_i32_1 = arith.constant 0 : i32
    return %c0_i32, %c0_i32_0 : i32, i32
  }
  func.func @transform_6(%arg0: i32) -> (i32, i32) {
    %c0_i32 = arith.constant 0 : i32
    %c0_i32_0 = arith.constant 0 : i32
    return %arg0, %c0_i32 : i32, i32
  }
}

module attributes {stable_mosaic.version = 11 : i64} {
  func.func @_prediction_kernel_stacked(%arg0: i32, %arg1: memref<8x32xf32, #tpu.memory_space<vmem>>, %arg2: memref<8x32xf32, #tpu.memory_space<vmem>>, %arg3: memref<384x128xf32, #tpu.memory_space<vmem>>, %arg4: memref<1x128xf32, #tpu.memory_space<vmem>>, %arg5: memref<128x128xf32, #tpu.memory_space<vmem>>, %arg6: memref<1x128xf32, #tpu.memory_space<vmem>>, %arg7: memref<8x128xf32, #tpu.memory_space<vmem>>, %arg8: memref<8x384xf32, #tpu.memory_space<vmem>>) attributes {dimension_semantics = [#tpu.dimension_semantics<parallel>], iteration_bounds = array<i64: 1>, scalar_prefetch = 0 : i64, scratch_operands = 1 : i64, tpu.core_type = #tpu.core_type<tc>, window_params = [{transform_indices = @transform_0, window_bounds = array<i64: 8, 32>}, {transform_indices = @transform_1, window_bounds = array<i64: 8, 32>}, {pipeline_mode = #tpu.pipeline_mode<synchronous>, transform_indices = @transform_2, window_bounds = array<i64: 384, 128>}, {pipeline_mode = #tpu.pipeline_mode<synchronous>, transform_indices = @transform_3, window_bounds = array<i64: 1, 128>}, {pipeline_mode = #tpu.pipeline_mode<synchronous>, transform_indices = @transform_4, window_bounds = array<i64: 128, 128>}, {pipeline_mode = #tpu.pipeline_mode<synchronous>, transform_indices = @transform_5, window_bounds = array<i64: 1, 128>}, {transform_indices = @transform_6, window_bounds = array<i64: 8, 128>}]} {
    %c0 = arith.constant 0 : index
    %c0_0 = arith.constant 0 : index
    %0 = vector.load %arg1[%c0, %c0_0] : memref<8x32xf32, #tpu.memory_space<vmem>>, vector<8x32xf32>
    %c0_1 = arith.constant 0 : index
    %c0_2 = arith.constant 0 : index
    %1 = vector.load %arg2[%c0_1, %c0_2] : memref<8x32xf32, #tpu.memory_space<vmem>>, vector<8x32xf32>
    %2 = arith.mulf %0, %1 : vector<8x32xf32>
    %c0_3 = arith.constant 0 : index
    %c0_4 = arith.constant 0 : index
    %3 = vector.load %arg8[%c0_3, %c0_4] : memref<8x384xf32, #tpu.memory_space<vmem>>, vector<8x32xf32>
    tpu.vector_store %arg8[%c0_3, %c0_4], %0 {strides = array<i32>} : memref<8x384xf32, #tpu.memory_space<vmem>>, vector<8x32xf32>,
    %c0_5 = arith.constant 0 : index
    %c128 = arith.constant 128 : index
    %4 = vector.load %arg8[%c0_5, %c128] : memref<8x384xf32, #tpu.memory_space<vmem>>, vector<8x32xf32>
    tpu.vector_store %arg8[%c0_5, %c128], %1 {strides = array<i32>} : memref<8x384xf32, #tpu.memory_space<vmem>>, vector<8x32xf32>,
    %c0_6 = arith.constant 0 : index
    %c256 = arith.constant 256 : index
    %5 = vector.load %arg8[%c0_6, %c256] : memref<8x384xf32, #tpu.memory_space<vmem>>, vector<8x32xf32>
    tpu.vector_store %arg8[%c0_6, %c256], %2 {strides = array<i32>} : memref<8x384xf32, #tpu.memory_space<vmem>>, vector<8x32xf32>,
    %cst = arith.constant 0.000000e+00 : f32
    %6 = vector.broadcast %cst : f32 to vector<8x96xf32>
    %c0_7 = arith.constant 0 : index
    %c32 = arith.constant 32 : index
    %7 = vector.load %arg8[%c0_7, %c32] : memref<8x384xf32, #tpu.memory_space<vmem>>, vector<8x96xf32>
    tpu.vector_store %arg8[%c0_7, %c32], %6 {strides = array<i32>} : memref<8x384xf32, #tpu.memory_space<vmem>>, vector<8x96xf32>,
    %c0_8 = arith.constant 0 : index
    %c160 = arith.constant 160 : index
    %8 = vector.load %arg8[%c0_8, %c160] : memref<8x384xf32, #tpu.memory_space<vmem>>, vector<8x96xf32>
    tpu.vector_store %arg8[%c0_8, %c160], %6 {strides = array<i32>} : memref<8x384xf32, #tpu.memory_space<vmem>>, vector<8x96xf32>,
    %c0_9 = arith.constant 0 : index
    %c288 = arith.constant 288 : index
    %9 = vector.load %arg8[%c0_9, %c288] : memref<8x384xf32, #tpu.memory_space<vmem>>, vector<8x96xf32>
    tpu.vector_store %arg8[%c0_9, %c288], %6 {strides = array<i32>} : memref<8x384xf32, #tpu.memory_space<vmem>>, vector<8x96xf32>,
    %c0_10 = arith.constant 0 : index
    %c0_11 = arith.constant 0 : index
    %10 = vector.load %arg8[%c0_10, %c0_11] : memref<8x384xf32, #tpu.memory_space<vmem>>, vector<8x384xf32>
    %c0_12 = arith.constant 0 : index
    %c0_13 = arith.constant 0 : index
    %11 = vector.load %arg3[%c0_12, %c0_13] : memref<384x128xf32, #tpu.memory_space<vmem>>, vector<384x128xf32>
    %cst_14 = arith.constant dense<0.000000e+00> : vector<8x128xf32>
    %12 = tpu.matmul %10, %11, %cst_14 {dimension_numbers = #tpu.dot_dimension_numbers<[1], [0], [0], [1], [0, 0, 1, 1], [], []>} : vector<8x384xf32>, vector<384x128xf32>, vector<8x128xf32> -> vector<8x128xf32>
    %c0_15 = arith.constant 0 : index
    %c0_16 = arith.constant 0 : index
    %13 = vector.load %arg4[%c0_15, %c0_16] : memref<1x128xf32, #tpu.memory_space<vmem>>, vector<1x128xf32>
    %14 = vector.broadcast %13 : vector<1x128xf32> to vector<8x128xf32>
    %15 = arith.addf %12, %14 : vector<8x128xf32>
    %cst_17 = arith.constant 0.000000e+00 : f32
    %16 = vector.broadcast %cst_17 : f32 to vector<8x128xf32>
    %17 = arith.maximumf %15, %16 : vector<8x128xf32>
    %c0_18 = arith.constant 0 : index
    %c0_19 = arith.constant 0 : index
    %18 = vector.load %arg5[%c0_18, %c0_19] : memref<128x128xf32, #tpu.memory_space<vmem>>, vector<128x128xf32>
    %cst_20 = arith.constant dense<0.000000e+00> : vector<8x128xf32>
    %19 = tpu.matmul %17, %18, %cst_20 {dimension_numbers = #tpu.dot_dimension_numbers<[1], [0], [0], [1], [0, 0, 1, 1], [], []>} : vector<8x128xf32>, vector<128x128xf32>, vector<8x128xf32> -> vector<8x128xf32>
    %c0_21 = arith.constant 0 : index
    %c0_22 = arith.constant 0 : index
    %20 = vector.load %arg6[%c0_21, %c0_22] : memref<1x128xf32, #tpu.memory_space<vmem>>, vector<1x128xf32>
    %21 = vector.broadcast %20 : vector<1x128xf32> to vector<8x128xf32>
    %22 = arith.addf %19, %21 : vector<8x128xf32>
    %c0_23 = arith.constant 0 : index
    %c0_24 = arith.constant 0 : index
    %23 = vector.load %arg7[%c0_23, %c0_24] : memref<8x128xf32, #tpu.memory_space<vmem>>, vector<8x128xf32>
    tpu.vector_store %arg7[%c0_23, %c0_24], %22 {strides = array<i32>} : memref<8x128xf32, #tpu.memory_space<vmem>>, vector<8x128xf32>,
    return
  }
  func.func @transform_0(%arg0: i32) -> (i32, i32) {
    %c0_i32 = arith.constant 0 : i32
    %c0_i32_0 = arith.constant 0 : i32
    return %arg0, %c0_i32 : i32, i32
  }
  func.func @transform_1(%arg0: i32) -> (i32, i32) {
    %c0_i32 = arith.constant 0 : i32
    %c0_i32_0 = arith.constant 0 : i32
    return %arg0, %c0_i32 : i32, i32
  }
  func.func @transform_2(%arg0: i32) -> (i32, i32) {
    %c0_i32 = arith.constant 0 : i32
    %c0_i32_0 = arith.constant 0 : i32
    %c0_i32_1 = arith.constant 0 : i32
    return %c0_i32, %c0_i32_0 : i32, i32
  }
  func.func @transform_3(%arg0: i32) -> (i32, i32) {
    %c0_i32 = arith.constant 0 : i32
    %c0_i32_0 = arith.constant 0 : i32
    %c0_i32_1 = arith.constant 0 : i32
    return %c0_i32, %c0_i32_0 : i32, i32
  }
  func.func @transform_4(%arg0: i32) -> (i32, i32) {
    %c0_i32 = arith.constant 0 : i32
    %c0_i32_0 = arith.constant 0 : i32
    %c0_i32_1 = arith.constant 0 : i32
    return %c0_i32, %c0_i32_0 : i32, i32
  }
  func.func @transform_5(%arg0: i32) -> (i32, i32) {
    %c0_i32 = arith.constant 0 : i32
    %c0_i32_0 = arith.constant 0 : i32
    %c0_i32_1 = arith.constant 0 : i32
    return %c0_i32, %c0_i32_0 : i32, i32
  }
  func.func @transform_6(%arg0: i32) -> (i32, i32) {
    %c0_i32 = arith.constant 0 : i32
    %c0_i32_0 = arith.constant 0 : i32
    return %arg0, %c0_i32 : i32, i32
  }
}

</mosaic_0001>

<bundles_post_ra>
// kernel: tpu_custom_call.1
= control target key start
LH: loop header
LB: loop body
LE: loop exit
PB: predicated region body
PF: predicated region fallthrough
CT: control target
= control target key end

     0   :  { %11 = vsyncpa [#allocation4], 0  ;;  %s764_s0 = inlined_call_operand.hbm [shape: f32[8,32], index: 0, kind: input, shape index: {}]   ;;  %s765_s1 = inlined_call_operand.hbm [shape: f32[8,32], index: 1, kind: input, shape index: {}]   ;;  %s766_s2 = inlined_call_operand.hbm [shape: f32[384,128], index: 2, kind: input, shape index: {}]   ;;  %s767_s3 = inlined_call_operand.vmem [shape: f32[1,128], index: 3, kind: input, shape index: {}]   ;;  %s768_s4 = inlined_call_operand.hbm [shape: f32[128,128], index: 4, kind: input, shape index: {}]   ;;  %s769_s5 = inlined_call_operand.vmem [shape: f32[1,128], index: 5, kind: input, shape index: {}]   ;;  %s770_s6 = inlined_call_operand.hbm [shape: f32[8,128], index: 6, kind: output, shape index: {}]  }
   0x1   :  { %12 = vsyncpa [#allocation7], 0 }
   0x2   :  { %13 = vsyncpa [#allocation10], 0 }
   0x3   :  { %14 = vsyncpa [#allocation5], 0  ;;  %s654_s21 = smov [#allocation6]   ;;  %s655_s23 = smov [#allocation3]  }
   0x4   :  { %s31_s22 = sshll.u32 %s654_s21, 4  ;;  %s21_s24 = sshll.u32 %s655_s23, 4  ;;  %s32_s22 = int_to_ptr.vmem [resolvable:$true] %s31_s22  ;;  %s22_s24 = int_to_ptr.vmem [resolvable:$true] %s21_s24 }
   0x5   :  { %s554_s25 = scalar_lea.vmem %s32_s22, 128  ;;  %p559_p1 = scmp.lt.s32.totalorder %s32_s22, %s32_s22 }
   0x6   :  { %p555_p0 = scmp.ne.s32.totalorder %s32_s22, %s554_s25  ;;  %p560_p2 = scmp.lt.s32.totalorder %s554_s25, %s554_s25 }
   0x8   :  { %p561_p3 = por %p560_p2, %p559_p1 }
   0xa   :  { %p562_p4 = pnand %p561_p3, %p555_p0 }
   0xc   :  { %565 = shalt.err (!%p562_p4)
}
   0xd   :  { %34 = dma.hbm_to_vmem [thread:$0]  %s765_s1, 128, %s32_s22, [#allocation7]  }
   0xe   :  { %s574_s28 = scalar_lea.vmem %s22_s24, 128  ;;  %p579_p6 = scmp.lt.s32.totalorder %s22_s24, %s22_s24 }
   0xf   :  { %p575_p5 = scmp.ne.s32.totalorder %s22_s24, %s574_s28  ;;  %p580_p7 = scmp.lt.s32.totalorder %s574_s28, %s574_s28 }
  0x11   :  { %p581_p8 = por %p580_p7, %p579_p6 }
  0x13   :  { %p582_p9 = pnand %p581_p8, %p575_p5 }
  0x15   :  { %585 = shalt.err (!%p582_p9)
}
  0x16   :  { %24 = dma.hbm_to_vmem [thread:$0]  %s764_s0, 128, %s22_s24, [#allocation4]  }
  0x17   :  { %s656_s7 = smov [#allocation8]  }
  0x18   :  { %s40_s8 = sshll.u32 %s656_s7, 4  ;;  %s41_s8 = int_to_ptr.vmem [resolvable:$true] %s40_s8 }
  0x19   :  { %s594_s9 = scalar_lea.vmem %s41_s8, 6144  ;;  %p599_p11 = scmp.lt.s32.totalorder %s41_s8, %s41_s8 }
  0x1a   :  { %p595_p10 = scmp.ne.s32.totalorder %s41_s8, %s594_s9  ;;  %p600_p12 = scmp.lt.s32.totalorder %s594_s9, %s594_s9 }
  0x1c   :  { %p601_p13 = por %p600_p12, %p599_p11 }
  0x1e   :  { %p602_p0 = pnand %p601_p13, %p595_p10 }
  0x20   :  { %605 = shalt.err (!%p602_p0)
}
  0x21   :  { %s657_s1 = smov 128   ;;  %s658_s10 = smov 8  }
  0x22   :  { %46 = dma.hbm_to_vmem [thread:$0]  %s766_s2, 6144, %s41_s8, [#allocation7], %s657_s1, %s657_s1, %s658_s10  }
  0x23   :  { %s659_s13 = smov [#allocation9]  }
  0x24   :  { %s54_s14 = sshll.u32 %s659_s13, 4  ;;  %s55_s14 = int_to_ptr.vmem [resolvable:$true] %s54_s14 }
  0x25   :  { %s614_s0 = scalar_lea.vmem %s55_s14, 2048  ;;  %p619_p2 = scmp.lt.s32.totalorder %s55_s14, %s55_s14 }
  0x26   :  { %p615_p1 = scmp.ne.s32.totalorder %s55_s14, %s614_s0  ;;  %p620_p3 = scmp.lt.s32.totalorder %s614_s0, %s614_s0 }
  0x28   :  { %p621_p4 = por %p620_p3, %p619_p2 }
  0x2a   :  { %p622_p5 = pnand %p621_p4, %p615_p1 }
  0x2c   :  { %625 = shalt.err (!%p622_p5)
}
  0x2d   :  { %60 = dma.hbm_to_vmem [thread:$0]  %s768_s4, 2048, %s55_s14, [#allocation10], %s657_s1, %s657_s1, %s658_s10  }
  0x2e   :  { %646 = dma.done.wait [#allocation4], 128  }
  0x2f   :  { %647 = vsyncadd [#allocation4], 4294967168 }
  0x30   :  { %648 = dma.done.wait [#allocation7], 6272  }
  0x31   :  { %649 = vsyncadd [#allocation7], 4294961024 }
  0x32   :  { %650 = dma.done.wait [#allocation10], 2048  }
  0x33   :  { %651 = vsyncadd [#allocation10], 4294965248  ;;  %v660_v0 = vmov 0.0   ;;  %vm661_vm0 = vmmov 0   ;;  %v120_v1 = vld [vmem:[#allocation8 + $0xf8] sm:$0xff]  ;;  %v119_v3 = vld [vmem:[#allocation8 + $0xf0] sm:$0xff] }
  0x34   :  { %467 = vmatprep.subr.mxu1 %v660_v0  ;;  %499 = vmatprep.mubr.msk.f32.mxu1 %vm661_vm0, %v660_v0  ;;  %v104_v2 = vld [vmem:[#allocation8 + $0x78] sm:$0xff]  ;;  %v103_v4 = vld [vmem:[#allocation8 + $0x70] sm:$0xff]  ;;  %v118_v5 = vld [vmem:[#allocation8 + $0xe8] sm:$0xff]  ;;  %vm78_vm1 = vcmask 261120   ;;  %vm82_vm2 = vcmask 1047808   ;;  %s662_s19 = smov [#allocation11]  }
  0x35   :  { %398 = vmatprep.subr.mxu0 %v120_v1  ;;  %v136_v6 = vld [vmem:[#allocation8 + $0x178] sm:$0xff]  ;;  %v102_v7 = vld [vmem:[#allocation8 + $0x68] sm:$0xff]  ;;  %v135_v8 = vld [vmem:[#allocation8 + $0x170] sm:$0xff]  ;;  %s385_s20 = sshll.u32 %s662_s19, 4  ;;  %s386_s20 = int_to_ptr.vmem [resolvable:$true] %s385_s20 }
  0x36   :  { %399 = vmatpush3.msra.mxu0 %v104_v2  ;;  %468 = vmatpush3.msra.mxu1 %v136_v6  ;;  %v117_v9 = vld [vmem:[#allocation8 + $0xe0] sm:$0xff]  ;;  %v134_v10 = vld [vmem:[#allocation8 + $0x168] sm:$0xff]  ;;  %v116_v12 = vld [vmem:[#allocation8 + $0xd8] sm:$0xff]  ;;  %s626_s21 = scalar_lea.vmem %s386_s20, 128  ;;  %p631_p7 = scmp.lt.s32.totalorder %s386_s20, %s386_s20 }
  0x37   :  { %400 = vmatprep.subr.mxu0 %v119_v3  ;;  %469 = vmatprep.subr.mxu1 %v660_v0  ;;  %v101_v11 = vld [vmem:[#allocation8 + $0x60] sm:$0xff]  ;;  %v100_v14 = vld [vmem:[#allocation8 + $0x58] sm:$0xff]  ;;  %v115_v15 = vld [vmem:[#allocation8 + $0xd0] sm:$0xff]  ;;  %p627_p6 = scmp.ne.s32.totalorder %s386_s20, %s626_s21  ;;  %p632_p8 = scmp.lt.s32.totalorder %s626_s21, %s626_s21 }
  0x38   :  { %401 = vmatpush3.msra.mxu0 %v103_v4  ;;  %470 = vmatpush3.msra.mxu1 %v135_v8  ;;  %v133_v13 = vld [vmem:[#allocation8 + $0x160] sm:$0xff]  ;;  %v132_v16 = vld [vmem:[#allocation8 + $0x158] sm:$0xff]  ;;  %v99_v17 = vld [vmem:[#allocation8 + $0x50] sm:$0xff] }
  0x39   :  { %402 = vmatprep.subr.mxu0 %v118_v5  ;;  %471 = vmatprep.subr.mxu1 %v660_v0  ;;  %v114_v18 = vld [vmem:[#allocation8 + $0xc8] sm:$0xff]  ;;  %v131_v19 = vld [vmem:[#allocation8 + $0x150] sm:$0xff]  ;;  %v113_v21 = vld [vmem:[#allocation8 + $0xc0] sm:$0xff]  ;;  %p633_p9 = por %p632_p8, %p631_p7 }
  0x3a   :  { %403 = vmatpush3.msra.mxu0 %v102_v7  ;;  %472 = vmatpush3.msra.mxu1 %v134_v10  ;;  %v98_v20 = vld [vmem:[#allocation8 + $0x48] sm:$0xff]  ;;  %v97_v23 = vld [vmem:[#allocation8 + $0x40] sm:$0xff]  ;;  %v112_v24 = vld [vmem:[#allocation8 + $0xb8] sm:$0xff] }
  0x3b   :  { %404 = vmatprep.subr.mxu0 %v117_v9  ;;  %473 = vmatprep.subr.mxu1 %v660_v0  ;;  %v130_v22 = vld [vmem:[#allocation8 + $0x148] sm:$0xff]  ;;  %v129_v25 = vld [vmem:[#allocation8 + $0x140] sm:$0xff]  ;;  %v96_v26 = vld [vmem:[#allocation8 + $0x38] sm:$0xff]  ;;  %p634_p10 = pnand %p633_p9, %p627_p6 }
  0x3c   :  { %405 = vmatpush3.msra.mxu0 %v101_v11  ;;  %474 = vmatpush3.msra.mxu1 %v133_v13  ;;  %v75_v27 = vld [vmem:[#allocation3] sm:$0xff]  ;;  %v76_v28 = vld [vmem:[#allocation6] sm:$0xff]  ;;  %v110_v33 = vld [vmem:[#allocation8 + $0xa8] sm:$0xff] }
  0x3d   :  { %406 = vmatprep.subr.mxu0 %v116_v12  ;;  %475 = vmatprep.subr.mxu1 %v660_v0  ;;  %v111_v29 = vld [vmem:[#allocation8 + $0xb0] sm:$0xff]  ;;  %v128_v30 = vld [vmem:[#allocation8 + $0x138] sm:$0xff]  ;;  %v77_v31 = vmul.f32 %v76_v28, %v75_v27  ;;  %80 = vst.msk [vmem:[#allocation2 + $0x8] sm:$0xff] %vm78_vm1, %v76_v28  ;;  %79 = vst.msk [vmem:[#allocation2] sm:$0xff] %vm78_vm1, %v75_v27 }
  0x3e   :  { %407 = vmatpush3.msra.mxu0 %v100_v14  ;;  %476 = vmatpush3.msra.mxu1 %v132_v16  ;;  %v95_v32 = vld [vmem:[#allocation8 + $0x30] sm:$0xff]  ;;  %84 = vst.msk [vmem:[#allocation2 + $0x8] sm:$0xff] %vm82_vm2, %v660_v0  ;;  %83 = vst.msk [vmem:[#allocation2] sm:$0xff] %vm82_vm2, %v660_v0  ;;  %v94_v35 = vld [vmem:[#allocation8 + $0x28] sm:$0xff] }
  0x3f   :  { %408 = vmatprep.subr.mxu0 %v115_v15  ;;  %477 = vmatprep.subr.mxu1 %v660_v0  ;;  %v127_v34 = vld [vmem:[#allocation8 + $0x130] sm:$0xff]  ;;  %81 = vst.msk [vmem:[#allocation2 + $0x10] sm:$0xff] %vm78_vm1, %v77_v31  ;;  %v109_v36 = vld [vmem:[#allocation8 + $0xa0] sm:$0xff]  ;;  %v126_v37 = vld [vmem:[#allocation8 + $0x128] sm:$0xff] }
  0x40   :  { %409 = vmatpush3.msra.mxu0 %v99_v17  ;;  %478 = vmatpush3.msra.mxu1 %v131_v19  ;;  %85 = vst.msk [vmem:[#allocation2 + $0x10] sm:$0xff] %vm82_vm2, %v660_v0  ;;  %v93_v38 = vld [vmem:[#allocation8 + $0x20] sm:$0xff]  ;;  %v108_v39 = vld [vmem:[#allocation8 + $0x98] sm:$0xff]  ;;  %v107_v42 = vld [vmem:[#allocation8 + $0x90] sm:$0xff] }
  0x41   :  { %410 = vmatprep.subr.mxu0 %v114_v18  ;;  %479 = vmatprep.subr.mxu1 %v660_v0  ;;  %v125_v40 = vld [vmem:[#allocation8 + $0x120] sm:$0xff]  ;;  %v92_v41 = vld [vmem:[#allocation8 + $0x18] sm:$0xff]  ;;  %v91_v44 = vld [vmem:[#allocation8 + $0x10] sm:$0xff] }
  0x42   :  { %411 = vmatpush3.msra.mxu0 %v98_v20  ;;  %480 = vmatpush3.msra.mxu1 %v130_v22  ;;  %v124_v43 = vld [vmem:[#allocation8 + $0x118] sm:$0xff]  ;;  %v106_v45 = vld [vmem:[#allocation8 + $0x88] sm:$0xff]  ;;  %v123_v48 = vld [vmem:[#allocation8 + $0x110] sm:$0xff] }
  0x43   :  { %412 = vmatprep.subr.mxu0 %v113_v21  ;;  %481 = vmatprep.subr.mxu1 %v660_v0  ;;  %v90_v47 = vld [vmem:[#allocation8 + $0x8] sm:$0xff]  ;;  %v105_v49 = vld [vmem:[#allocation8 + $0x80] sm:$0xff]  ;;  %v300_v55 = vld [vmem:[#allocation9 + $0x78] sm:$0xff] }
  0x44   :  { %413 = vmatpush3.msra.mxu0 %v97_v23  ;;  %482 = vmatpush3.msra.mxu1 %v129_v25  ;;  %v89_v50 = vld [vmem:[#allocation8] sm:$0xff]  ;;  %v122_v51 = vld [vmem:[#allocation8 + $0x108] sm:$0xff]  ;;  %v299_v56 = vld [vmem:[#allocation9 + $0x70] sm:$0xff] }
  0x45   :  { %414 = vmatprep.subr.mxu0 %v112_v24  ;;  %483 = vmatprep.subr.mxu1 %v660_v0  ;;  %v87_v46 = vld [vmem:[#allocation2 + $0x8] sm:$0xff]  ;;  %v86_v52 = vld [vmem:[#allocation2] sm:$0xff]  ;;  %v298_v57 = vld [vmem:[#allocation9 + $0x68] sm:$0xff] }
  0x46   :  { %415 = vmatpush3.msra.mxu0 %v96_v26  ;;  %484 = vmatpush3.msra.mxu1 %v128_v30  ;;  %v121_v53 = vld [vmem:[#allocation8 + $0x100] sm:$0xff]  ;;  %v296_v59 = vld [vmem:[#allocation9 + $0x58] sm:$0xff]  ;;  %v295_v60 = vld [vmem:[#allocation9 + $0x50] sm:$0xff] }
  0x47   :  { %416 = vmatprep.subr.mxu0 %v111_v29  ;;  %485 = vmatprep.subr.mxu1 %v660_v0  ;;  %v88_v54 = vld [vmem:[#allocation2 + $0x10] sm:$0xff]  ;;  %v297_v58 = vld [vmem:[#allocation9 + $0x60] sm:$0xff]  ;;  %v292_v63 = vld [vmem:[#allocation9 + $0x38] sm:$0xff] }
  0x48   :  { %417 = vmatpush3.msra.mxu0 %v95_v32  ;;  %486 = vmatpush3.msra.mxu1 %v127_v34  ;;  %v294_v61 = vld [vmem:[#allocation9 + $0x48] sm:$0xff]  ;;  %v293_v62 = vld [vmem:[#allocation9 + $0x40] sm:$0xff]  ;;  %v291_v1 = vld [vmem:[#allocation9 + $0x30] sm:$0xff] }
  0x49   :  { %418 = vmatprep.subr.mxu0 %v110_v33  ;;  %487 = vmatprep.subr.mxu1 %v660_v0  ;;  %v290_v2 = vld [vmem:[#allocation9 + $0x28] sm:$0xff]  ;;  %v289_v3 = vld [vmem:[#allocation9 + $0x20] sm:$0xff]  ;;  %v288_v4 = vld [vmem:[#allocation9 + $0x18] sm:$0xff] }
  0x4a   :  { %419 = vmatpush3.msra.mxu0 %v94_v35  ;;  %488 = vmatpush3.msra.mxu1 %v126_v37  ;;  %v287_v5 = vld [vmem:[#allocation9 + $0x10] sm:$0xff]  ;;  %v286_v6 = vld [vmem:[#allocation9 + $0x8] sm:$0xff]  ;;  %v285_v7 = vld [vmem:[#allocation9] sm:$0xff] }
  0x4b   :  { %420 = vmatprep.subr.mxu0 %v109_v36  ;;  %489 = vmatprep.subr.mxu1 %v660_v0  ;;  %v396_v10 = vld [vmem:[%s767_s3] ss:$0 sm:$0xff] }
  0x4c   :  { %421 = vmatpush3.msra.mxu0 %v93_v38  ;;  %490 = vmatpush3.msra.mxu1 %v125_v40  ;;  %v397_v17 = vld [vmem:[%s769_s5] ss:$0 sm:$0xff] }
  0x4d   :  { %422 = vmatprep.subr.mxu0 %v108_v39  ;;  %491 = vmatprep.subr.mxu1 %v660_v0 }
  0x4e   :  { %423 = vmatpush3.msra.mxu0 %v92_v41  ;;  %492 = vmatpush3.msra.mxu1 %v124_v43 }
  0x4f   :  { %424 = vmatprep.subr.mxu0 %v107_v42  ;;  %493 = vmatprep.subr.mxu1 %v660_v0 }
  0x50   :  { %425 = vmatpush3.msra.mxu0 %v91_v44  ;;  %208 = vmatprep.mubr.f32.mxu0 %v87_v46 }
  0x51   :  { %426 = vmatprep.subr.mxu0 %v106_v45  ;;  %494 = vmatpush3.msra.mxu1 %v123_v48 }
  0x52   :  { %427 = vmatpush3.msra.mxu0 %v90_v47  ;;  %495 = vmatprep.subr.mxu1 %v660_v0 }
  0x53   :  { %428 = vmatprep.subr.mxu0 %v105_v49  ;;  %496 = vmatpush3.msra.mxu1 %v122_v51 }
  0x54   :  { %429 = vmatpush3.msra.mxu0 %v89_v50  ;;  %497 = vmatprep.subr.mxu1 %v660_v0 }
  0x55   :  { %209 = vmatmul.mubr.f32.vlgmr.msra.gmra.mxu0 %v86_v52  ;;  %498 = vmatpush3.msra.mxu1 %v121_v53 }
  0x56   :  { %502 = vmatprep.subr.mxu0 %v660_v0  ;;  %500 = vmatmul.mubr.f32.vlgmr.msra.gmra.mxu1 %v88_v54 }
  0x57   :  { %503 = vmatpush3.msra.mxu0 %v300_v55  ;;  %534 = vmatprep.mubr.msk.f32.mxu0 %vm661_vm0, %v660_v0 }
  0x58   :  { %504 = vmatprep.subr.mxu0 %v660_v0 }
  0x59   :  { %505 = vmatpush3.msra.mxu0 %v299_v56 }
  0x5a   :  { %506 = vmatprep.subr.mxu0 %v660_v0 }
  0x5b   :  { %507 = vmatpush3.msra.mxu0 %v298_v57 }
  0x5c   :  { %508 = vmatprep.subr.mxu0 %v660_v0 }
  0x5d   :  { %509 = vmatpush3.msra.mxu0 %v297_v58 }
  0x5e   :  { %510 = vmatprep.subr.mxu0 %v660_v0 }
  0x5f   :  { %511 = vmatpush3.msra.mxu0 %v296_v59 }
  0x60   :  { %512 = vmatprep.subr.mxu0 %v660_v0 }
  0x61   :  { %513 = vmatpush3.msra.mxu0 %v295_v60 }
  0x62   :  { %514 = vmatprep.subr.mxu0 %v660_v0 }
  0x63   :  { %515 = vmatpush3.msra.mxu0 %v294_v61 }
  0x64   :  { %516 = vmatprep.subr.mxu0 %v660_v0 }
  0x65   :  { %517 = vmatpush3.msra.mxu0 %v293_v62 }
  0x66   :  { %518 = vmatprep.subr.mxu0 %v660_v0 }
  0x67   :  { %519 = vmatpush3.msra.mxu0 %v292_v63 }
  0x68   :  { %520 = vmatprep.subr.mxu0 %v660_v0 }
  0x69   :  { %521 = vmatpush3.msra.mxu0 %v291_v1 }
  0x6a   :  { %522 = vmatprep.subr.mxu0 %v660_v0 }
  0x6b   :  { %523 = vmatpush3.msra.mxu0 %v290_v2 }
  0x6c   :  { %524 = vmatprep.subr.mxu0 %v660_v0 }
  0x6d   :  { %525 = vmatpush3.msra.mxu0 %v289_v3 }
  0x6e   :  { %526 = vmatprep.subr.mxu0 %v660_v0 }
  0x6f   :  { %527 = vmatpush3.msra.mxu0 %v288_v4 }
  0x70   :  { %528 = vmatprep.subr.mxu0 %v660_v0 }
  0x71   :  { %529 = vmatpush3.msra.mxu0 %v287_v5 }
  0x72   :  { %530 = vmatprep.subr.mxu0 %v660_v0 }
  0x73   :  { %531 = vmatpush3.msra.mxu0 %v286_v6 }
  0x74   :  { %532 = vmatprep.subr.mxu0 %v660_v0 }
  0x75   :  { %533 = vmatpush3.msra.mxu0 %v285_v7 }
 0x115   :  { %v430_v8 = vpop.f32.mrf.mxu0 }
 0x116   :  { %v280_v11 = vpop.f32.mrf.mxu1 }
 0x117   :  { %v431_v9 = vpop.f32.mrf.mxu0 }
 0x118   :  { %v432_v12 = vadd.f32 %v431_v9, %v430_v8  ;;  %v501_v13 = vpop.f32.mrf.mxu1 }
 0x11a   :  { %v211_v14 = vadd.f32 %v432_v12, %v396_v10 }
 0x11c   :  { %v281_v15 = vadd.f32 %v280_v11, %v211_v14 }
 0x11e   :  { %v284_v16 = vmax.f32 %v281_v15, 0.0 }
 0x120   :  { %535 = vmatmul.mubr.f32.vlgmr.msra.gmra.mxu0 %v284_v16 }
 0x1e0   :  { %v374_v0 = vpop.f32.mrf.mxu0 }
 0x1e1   :  { %v375_v18 = vadd.f32 %v397_v17, %v374_v0 }
 0x1e2   :  { %v536_v19 = vpop.f32.mrf.mxu0 }
 0x1e3   :  { %378 = vst [vmem:[#allocation11] sm:$0xff] %v375_v18 }
 0x1e4   :  { %637 = shalt.err (!%p634_p10)
}
 0x1e5   :  { %388 = dma.vmem_to_hbm [thread:$0]  %s386_s20, 128, %s770_s6, [#allocation5]  }
 0x1e6   :  { %652 = dma.done.wait [#allocation5], 128  }
 0x1e7   :  { %653 = vsyncadd [#allocation5], 4294967168 }
 0x1e8   :  { %392 = vsyncpa [#allocation4], 1 }
 0x1e9   :  { %393 = vsyncpa [#allocation7], 1 }
 0x1ea   :  { %394 = vsyncpa [#allocation10], 1 }
 0x1eb   :  { %395 = vsyncpa [#allocation5], 1 }

// kernel: tpu_custom_call.1
= control target key start
LH: loop header
LB: loop body
LE: loop exit
PB: predicated region body
PF: predicated region fallthrough
CT: control target
= control target key end

     0   :  { %11 = vsyncpa [#allocation4], 0  ;;  %s764_s0 = inlined_call_operand.hbm [shape: f32[8,32], index: 0, kind: input, shape index: {}]   ;;  %s765_s1 = inlined_call_operand.hbm [shape: f32[8,32], index: 1, kind: input, shape index: {}]   ;;  %s766_s2 = inlined_call_operand.hbm [shape: f32[384,128], index: 2, kind: input, shape index: {}]   ;;  %s767_s3 = inlined_call_operand.vmem [shape: f32[1,128], index: 3, kind: input, shape index: {}]   ;;  %s768_s4 = inlined_call_operand.hbm [shape: f32[128,128], index: 4, kind: input, shape index: {}]   ;;  %s769_s5 = inlined_call_operand.vmem [shape: f32[1,128], index: 5, kind: input, shape index: {}]   ;;  %s770_s6 = inlined_call_operand.hbm [shape: f32[8,128], index: 6, kind: output, shape index: {}]  }
   0x1   :  { %12 = vsyncpa [#allocation7], 0 }
   0x2   :  { %13 = vsyncpa [#allocation10], 0 }
   0x3   :  { %14 = vsyncpa [#allocation5], 0  ;;  %s654_s21 = smov [#allocation6]   ;;  %s655_s23 = smov [#allocation3]  }
   0x4   :  { %s31_s22 = sshll.u32 %s654_s21, 4  ;;  %s21_s24 = sshll.u32 %s655_s23, 4  ;;  %s32_s22 = int_to_ptr.vmem [resolvable:$true] %s31_s22  ;;  %s22_s24 = int_to_ptr.vmem [resolvable:$true] %s21_s24 }
   0x5   :  { %s554_s25 = scalar_lea.vmem %s32_s22, 128  ;;  %p559_p1 = scmp.lt.s32.totalorder %s32_s22, %s32_s22 }
   0x6   :  { %p555_p0 = scmp.ne.s32.totalorder %s32_s22, %s554_s25  ;;  %p560_p2 = scmp.lt.s32.totalorder %s554_s25, %s554_s25 }
   0x8   :  { %p561_p3 = por %p560_p2, %p559_p1 }
   0xa   :  { %p562_p4 = pnand %p561_p3, %p555_p0 }
   0xc   :  { %565 = shalt.err (!%p562_p4)
}
   0xd   :  { %34 = dma.hbm_to_vmem [thread:$0]  %s765_s1, 128, %s32_s22, [#allocation7]  }
   0xe   :  { %s574_s28 = scalar_lea.vmem %s22_s24, 128  ;;  %p579_p6 = scmp.lt.s32.totalorder %s22_s24, %s22_s24 }
   0xf   :  { %p575_p5 = scmp.ne.s32.totalorder %s22_s24, %s574_s28  ;;  %p580_p7 = scmp.lt.s32.totalorder %s574_s28, %s574_s28 }
  0x11   :  { %p581_p8 = por %p580_p7, %p579_p6 }
  0x13   :  { %p582_p9 = pnand %p581_p8, %p575_p5 }
  0x15   :  { %585 = shalt.err (!%p582_p9)
}
  0x16   :  { %24 = dma.hbm_to_vmem [thread:$0]  %s764_s0, 128, %s22_s24, [#allocation4]  }
  0x17   :  { %s656_s7 = smov [#allocation8]  }
  0x18   :  { %s40_s8 = sshll.u32 %s656_s7, 4  ;;  %s41_s8 = int_to_ptr.vmem [resolvable:$true] %s40_s8 }
  0x19   :  { %s594_s9 = scalar_lea.vmem %s41_s8, 6144  ;;  %p599_p11 = scmp.lt.s32.totalorder %s41_s8, %s41_s8 }
  0x1a   :  { %p595_p10 = scmp.ne.s32.totalorder %s41_s8, %s594_s9  ;;  %p600_p12 = scmp.lt.s32.totalorder %s594_s9, %s594_s9 }
  0x1c   :  { %p601_p13 = por %p600_p12, %p599_p11 }
  0x1e   :  { %p602_p0 = pnand %p601_p13, %p595_p10 }
  0x20   :  { %605 = shalt.err (!%p602_p0)
}
  0x21   :  { %s657_s1 = smov 128   ;;  %s658_s10 = smov 8  }
  0x22   :  { %46 = dma.hbm_to_vmem [thread:$0]  %s766_s2, 6144, %s41_s8, [#allocation7], %s657_s1, %s657_s1, %s658_s10  }
  0x23   :  { %s659_s13 = smov [#allocation9]  }
  0x24   :  { %s54_s14 = sshll.u32 %s659_s13, 4  ;;  %s55_s14 = int_to_ptr.vmem [resolvable:$true] %s54_s14 }
  0x25   :  { %s614_s0 = scalar_lea.vmem %s55_s14, 2048  ;;  %p619_p2 = scmp.lt.s32.totalorder %s55_s14, %s55_s14 }
  0x26   :  { %p615_p1 = scmp.ne.s32.totalorder %s55_s14, %s614_s0  ;;  %p620_p3 = scmp.lt.s32.totalorder %s614_s0, %s614_s0 }
  0x28   :  { %p621_p4 = por %p620_p3, %p619_p2 }
  0x2a   :  { %p622_p5 = pnand %p621_p4, %p615_p1 }
  0x2c   :  { %625 = shalt.err (!%p622_p5)
}
  0x2d   :  { %60 = dma.hbm_to_vmem [thread:$0]  %s768_s4, 2048, %s55_s14, [#allocation10], %s657_s1, %s657_s1, %s658_s10  }
  0x2e   :  { %646 = dma.done.wait [#allocation4], 128  }
  0x2f   :  { %647 = vsyncadd [#allocation4], 4294967168 }
  0x30   :  { %648 = dma.done.wait [#allocation7], 6272  }
  0x31   :  { %649 = vsyncadd [#allocation7], 4294961024 }
  0x32   :  { %650 = dma.done.wait [#allocation10], 2048  }
  0x33   :  { %651 = vsyncadd [#allocation10], 4294965248  ;;  %v660_v0 = vmov 0.0   ;;  %vm661_vm0 = vmmov 0   ;;  %v120_v1 = vld [vmem:[#allocation8 + $0xf8] sm:$0xff]  ;;  %v119_v3 = vld [vmem:[#allocation8 + $0xf0] sm:$0xff] }
  0x34   :  { %467 = vmatprep.subr.mxu1 %v660_v0  ;;  %499 = vmatprep.mubr.msk.f32.mxu1 %vm661_vm0, %v660_v0  ;;  %v104_v2 = vld [vmem:[#allocation8 + $0x78] sm:$0xff]  ;;  %v103_v4 = vld [vmem:[#allocation8 + $0x70] sm:$0xff]  ;;  %v118_v5 = vld [vmem:[#allocation8 + $0xe8] sm:$0xff]  ;;  %vm78_vm1 = vcmask 261120   ;;  %vm82_vm2 = vcmask 1047808   ;;  %s662_s19 = smov [#allocation11]  }
  0x35   :  { %398 = vmatprep.subr.mxu0 %v120_v1  ;;  %v136_v6 = vld [vmem:[#allocation8 + $0x178] sm:$0xff]  ;;  %v102_v7 = vld [vmem:[#allocation8 + $0x68] sm:$0xff]  ;;  %v135_v8 = vld [vmem:[#allocation8 + $0x170] sm:$0xff]  ;;  %s385_s20 = sshll.u32 %s662_s19, 4  ;;  %s386_s20 = int_to_ptr.vmem [resolvable:$true] %s385_s20 }
  0x36   :  { %399 = vmatpush3.msra.mxu0 %v104_v2  ;;  %468 = vmatpush3.msra.mxu1 %v136_v6  ;;  %v117_v9 = vld [vmem:[#allocation8 + $0xe0] sm:$0xff]  ;;  %v134_v10 = vld [vmem:[#allocation8 + $0x168] sm:$0xff]  ;;  %v116_v12 = vld [vmem:[#allocation8 + $0xd8] sm:$0xff]  ;;  %s626_s21 = scalar_lea.vmem %s386_s20, 128  ;;  %p631_p7 = scmp.lt.s32.totalorder %s386_s20, %s386_s20 }
  0x37   :  { %400 = vmatprep.subr.mxu0 %v119_v3  ;;  %469 = vmatprep.subr.mxu1 %v660_v0  ;;  %v101_v11 = vld [vmem:[#allocation8 + $0x60] sm:$0xff]  ;;  %v100_v14 = vld [vmem:[#allocation8 + $0x58] sm:$0xff]  ;;  %v115_v15 = vld [vmem:[#allocation8 + $0xd0] sm:$0xff]  ;;  %p627_p6 = scmp.ne.s32.totalorder %s386_s20, %s626_s21  ;;  %p632_p8 = scmp.lt.s32.totalorder %s626_s21, %s626_s21 }
  0x38   :  { %401 = vmatpush3.msra.mxu0 %v103_v4  ;;  %470 = vmatpush3.msra.mxu1 %v135_v8  ;;  %v133_v13 = vld [vmem:[#allocation8 + $0x160] sm:$0xff]  ;;  %v132_v16 = vld [vmem:[#allocation8 + $0x158] sm:$0xff]  ;;  %v99_v17 = vld [vmem:[#allocation8 + $0x50] sm:$0xff] }
  0x39   :  { %402 = vmatprep.subr.mxu0 %v118_v5  ;;  %471 = vmatprep.subr.mxu1 %v660_v0  ;;  %v114_v18 = vld [vmem:[#allocation8 + $0xc8] sm:$0xff]  ;;  %v131_v19 = vld [vmem:[#allocation8 + $0x150] sm:$0xff]  ;;  %v113_v21 = vld [vmem:[#allocation8 + $0xc0] sm:$0xff]  ;;  %p633_p9 = por %p632_p8, %p631_p7 }
  0x3a   :  { %403 = vmatpush3.msra.mxu0 %v102_v7  ;;  %472 = vmatpush3.msra.mxu1 %v134_v10  ;;  %v98_v20 = vld [vmem:[#allocation8 + $0x48] sm:$0xff]  ;;  %v97_v23 = vld [vmem:[#allocation8 + $0x40] sm:$0xff]  ;;  %v112_v24 = vld [vmem:[#allocation8 + $0xb8] sm:$0xff] }
  0x3b   :  { %404 = vmatprep.subr.mxu0 %v117_v9  ;;  %473 = vmatprep.subr.mxu1 %v660_v0  ;;  %v130_v22 = vld [vmem:[#allocation8 + $0x148] sm:$0xff]  ;;  %v129_v25 = vld [vmem:[#allocation8 + $0x140] sm:$0xff]  ;;  %v96_v26 = vld [vmem:[#allocation8 + $0x38] sm:$0xff]  ;;  %p634_p10 = pnand %p633_p9, %p627_p6 }
  0x3c   :  { %405 = vmatpush3.msra.mxu0 %v101_v11  ;;  %474 = vmatpush3.msra.mxu1 %v133_v13  ;;  %v75_v27 = vld [vmem:[#allocation3] sm:$0xff]  ;;  %v76_v28 = vld [vmem:[#allocation6] sm:$0xff]  ;;  %v110_v33 = vld [vmem:[#allocation8 + $0xa8] sm:$0xff] }
  0x3d   :  { %406 = vmatprep.subr.mxu0 %v116_v12  ;;  %475 = vmatprep.subr.mxu1 %v660_v0  ;;  %v111_v29 = vld [vmem:[#allocation8 + $0xb0] sm:$0xff]  ;;  %v128_v30 = vld [vmem:[#allocation8 + $0x138] sm:$0xff]  ;;  %v77_v31 = vmul.f32 %v76_v28, %v75_v27  ;;  %80 = vst.msk [vmem:[#allocation2 + $0x8] sm:$0xff] %vm78_vm1, %v76_v28  ;;  %79 = vst.msk [vmem:[#allocation2] sm:$0xff] %vm78_vm1, %v75_v27 }
  0x3e   :  { %407 = vmatpush3.msra.mxu0 %v100_v14  ;;  %476 = vmatpush3.msra.mxu1 %v132_v16  ;;  %v95_v32 = vld [vmem:[#allocation8 + $0x30] sm:$0xff]  ;;  %84 = vst.msk [vmem:[#allocation2 + $0x8] sm:$0xff] %vm82_vm2, %v660_v0  ;;  %83 = vst.msk [vmem:[#allocation2] sm:$0xff] %vm82_vm2, %v660_v0  ;;  %v94_v35 = vld [vmem:[#allocation8 + $0x28] sm:$0xff] }
  0x3f   :  { %408 = vmatprep.subr.mxu0 %v115_v15  ;;  %477 = vmatprep.subr.mxu1 %v660_v0  ;;  %v127_v34 = vld [vmem:[#allocation8 + $0x130] sm:$0xff]  ;;  %81 = vst.msk [vmem:[#allocation2 + $0x10] sm:$0xff] %vm78_vm1, %v77_v31  ;;  %v109_v36 = vld [vmem:[#allocation8 + $0xa0] sm:$0xff]  ;;  %v126_v37 = vld [vmem:[#allocation8 + $0x128] sm:$0xff] }
  0x40   :  { %409 = vmatpush3.msra.mxu0 %v99_v17  ;;  %478 = vmatpush3.msra.mxu1 %v131_v19  ;;  %85 = vst.msk [vmem:[#allocation2 + $0x10] sm:$0xff] %vm82_vm2, %v660_v0  ;;  %v93_v38 = vld [vmem:[#allocation8 + $0x20] sm:$0xff]  ;;  %v108_v39 = vld [vmem:[#allocation8 + $0x98] sm:$0xff]  ;;  %v107_v42 = vld [vmem:[#allocation8 + $0x90] sm:$0xff] }
  0x41   :  { %410 = vmatprep.subr.mxu0 %v114_v18  ;;  %479 = vmatprep.subr.mxu1 %v660_v0  ;;  %v125_v40 = vld [vmem:[#allocation8 + $0x120] sm:$0xff]  ;;  %v92_v41 = vld [vmem:[#allocation8 + $0x18] sm:$0xff]  ;;  %v91_v44 = vld [vmem:[#allocation8 + $0x10] sm:$0xff] }
  0x42   :  { %411 = vmatpush3.msra.mxu0 %v98_v20  ;;  %480 = vmatpush3.msra.mxu1 %v130_v22  ;;  %v124_v43 = vld [vmem:[#allocation8 + $0x118] sm:$0xff]  ;;  %v106_v45 = vld [vmem:[#allocation8 + $0x88] sm:$0xff]  ;;  %v123_v48 = vld [vmem:[#allocation8 + $0x110] sm:$0xff] }
  0x43   :  { %412 = vmatprep.subr.mxu0 %v113_v21  ;;  %481 = vmatprep.subr.mxu1 %v660_v0  ;;  %v90_v47 = vld [vmem:[#allocation8 + $0x8] sm:$0xff]  ;;  %v105_v49 = vld [vmem:[#allocation8 + $0x80] sm:$0xff]  ;;  %v300_v55 = vld [vmem:[#allocation9 + $0x78] sm:$0xff] }
  0x44   :  { %413 = vmatpush3.msra.mxu0 %v97_v23  ;;  %482 = vmatpush3.msra.mxu1 %v129_v25  ;;  %v89_v50 = vld [vmem:[#allocation8] sm:$0xff]  ;;  %v122_v51 = vld [vmem:[#allocation8 + $0x108] sm:$0xff]  ;;  %v299_v56 = vld [vmem:[#allocation9 + $0x70] sm:$0xff] }
  0x45   :  { %414 = vmatprep.subr.mxu0 %v112_v24  ;;  %483 = vmatprep.subr.mxu1 %v660_v0  ;;  %v87_v46 = vld [vmem:[#allocation2 + $0x8] sm:$0xff]  ;;  %v86_v52 = vld [vmem:[#allocation2] sm:$0xff]  ;;  %v298_v57 = vld [vmem:[#allocation9 + $0x68] sm:$0xff] }
  0x46   :  { %415 = vmatpush3.msra.mxu0 %v96_v26  ;;  %484 = vmatpush3.msra.mxu1 %v128_v30  ;;  %v121_v53 = vld [vmem:[#allocation8 + $0x100] sm:$0xff]  ;;  %v296_v59 = vld [vmem:[#allocation9 + $0x58] sm:$0xff]  ;;  %v295_v60 = vld [vmem:[#allocation9 + $0x50] sm:$0xff] }
  0x47   :  { %416 = vmatprep.subr.mxu0 %v111_v29  ;;  %485 = vmatprep.subr.mxu1 %v660_v0  ;;  %v88_v54 = vld [vmem:[#allocation2 + $0x10] sm:$0xff]  ;;  %v297_v58 = vld [vmem:[#allocation9 + $0x60] sm:$0xff]  ;;  %v292_v63 = vld [vmem:[#allocation9 + $0x38] sm:$0xff] }
  0x48   :  { %417 = vmatpush3.msra.mxu0 %v95_v32  ;;  %486 = vmatpush3.msra.mxu1 %v127_v34  ;;  %v294_v61 = vld [vmem:[#allocation9 + $0x48] sm:$0xff]  ;;  %v293_v62 = vld [vmem:[#allocation9 + $0x40] sm:$0xff]  ;;  %v291_v1 = vld [vmem:[#allocation9 + $0x30] sm:$0xff] }
  0x49   :  { %418 = vmatprep.subr.mxu0 %v110_v33  ;;  %487 = vmatprep.subr.mxu1 %v660_v0  ;;  %v290_v2 = vld [vmem:[#allocation9 + $0x28] sm:$0xff]  ;;  %v289_v3 = vld [vmem:[#allocation9 + $0x20] sm:$0xff]  ;;  %v288_v4 = vld [vmem:[#allocation9 + $0x18] sm:$0xff] }
  0x4a   :  { %419 = vmatpush3.msra.mxu0 %v94_v35  ;;  %488 = vmatpush3.msra.mxu1 %v126_v37  ;;  %v287_v5 = vld [vmem:[#allocation9 + $0x10] sm:$0xff]  ;;  %v286_v6 = vld [vmem:[#allocation9 + $0x8] sm:$0xff]  ;;  %v285_v7 = vld [vmem:[#allocation9] sm:$0xff] }
  0x4b   :  { %420 = vmatprep.subr.mxu0 %v109_v36  ;;  %489 = vmatprep.subr.mxu1 %v660_v0  ;;  %v396_v10 = vld [vmem:[%s767_s3] ss:$0 sm:$0xff] }
  0x4c   :  { %421 = vmatpush3.msra.mxu0 %v93_v38  ;;  %490 = vmatpush3.msra.mxu1 %v125_v40  ;;  %v397_v17 = vld [vmem:[%s769_s5] ss:$0 sm:$0xff] }
  0x4d   :  { %422 = vmatprep.subr.mxu0 %v108_v39  ;;  %491 = vmatprep.subr.mxu1 %v660_v0 }
  0x4e   :  { %423 = vmatpush3.msra.mxu0 %v92_v41  ;;  %492 = vmatpush3.msra.mxu1 %v124_v43 }
  0x4f   :  { %424 = vmatprep.subr.mxu0 %v107_v42  ;;  %493 = vmatprep.subr.mxu1 %v660_v0 }
  0x50   :  { %425 = vmatpush3.msra.mxu0 %v91_v44  ;;  %208 = vmatprep.mubr.f32.mxu0 %v87_v46 }
  0x51   :  { %426 = vmatprep.subr.mxu0 %v106_v45  ;;  %494 = vmatpush3.msra.mxu1 %v123_v48 }
  0x52   :  { %427 = vmatpush3.msra.mxu0 %v90_v47  ;;  %495 = vmatprep.subr.mxu1 %v660_v0 }
  0x53   :  { %428 = vmatprep.subr.mxu0 %v105_v49  ;;  %496 = vmatpush3.msra.mxu1 %v122_v51 }
  0x54   :  { %429 = vmatpush3.msra.mxu0 %v89_v50  ;;  %497 = vmatprep.subr.mxu1 %v660_v0 }
  0x55   :  { %209 = vmatmul.mubr.f32.vlgmr.msra.gmra.mxu0 %v86_v52  ;;  %498 = vmatpush3.msra.mxu1 %v121_v53 }
  0x56   :  { %502 = vmatprep.subr.mxu0 %v660_v0  ;;  %500 = vmatmul.mubr.f32.vlgmr.msra.gmra.mxu1 %v88_v54 }
  0x57   :  { %503 = vmatpush3.msra.mxu0 %v300_v55  ;;  %534 = vmatprep.mubr.msk.f32.mxu0 %vm661_vm0, %v660_v0 }
  0x58   :  { %504 = vmatprep.subr.mxu0 %v660_v0 }
  0x59   :  { %505 = vmatpush3.msra.mxu0 %v299_v56 }
  0x5a   :  { %506 = vmatprep.subr.mxu0 %v660_v0 }
  0x5b   :  { %507 = vmatpush3.msra.mxu0 %v298_v57 }
  0x5c   :  { %508 = vmatprep.subr.mxu0 %v660_v0 }
  0x5d   :  { %509 = vmatpush3.msra.mxu0 %v297_v58 }
  0x5e   :  { %510 = vmatprep.subr.mxu0 %v660_v0 }
  0x5f   :  { %511 = vmatpush3.msra.mxu0 %v296_v59 }
  0x60   :  { %512 = vmatprep.subr.mxu0 %v660_v0 }
  0x61   :  { %513 = vmatpush3.msra.mxu0 %v295_v60 }
  0x62   :  { %514 = vmatprep.subr.mxu0 %v660_v0 }
  0x63   :  { %515 = vmatpush3.msra.mxu0 %v294_v61 }
  0x64   :  { %516 = vmatprep.subr.mxu0 %v660_v0 }
  0x65   :  { %517 = vmatpush3.msra.mxu0 %v293_v62 }
  0x66   :  { %518 = vmatprep.subr.mxu0 %v660_v0 }
  0x67   :  { %519 = vmatpush3.msra.mxu0 %v292_v63 }
  0x68   :  { %520 = vmatprep.subr.mxu0 %v660_v0 }
  0x69   :  { %521 = vmatpush3.msra.mxu0 %v291_v1 }
  0x6a   :  { %522 = vmatprep.subr.mxu0 %v660_v0 }
  0x6b   :  { %523 = vmatpush3.msra.mxu0 %v290_v2 }
  0x6c   :  { %524 = vmatprep.subr.mxu0 %v660_v0 }
  0x6d   :  { %525 = vmatpush3.msra.mxu0 %v289_v3 }
  0x6e   :  { %526 = vmatprep.subr.mxu0 %v660_v0 }
  0x6f   :  { %527 = vmatpush3.msra.mxu0 %v288_v4 }
  0x70   :  { %528 = vmatprep.subr.mxu0 %v660_v0 }
  0x71   :  { %529 = vmatpush3.msra.mxu0 %v287_v5 }
  0x72   :  { %530 = vmatprep.subr.mxu0 %v660_v0 }
  0x73   :  { %531 = vmatpush3.msra.mxu0 %v286_v6 }
  0x74   :  { %532 = vmatprep.subr.mxu0 %v660_v0 }
  0x75   :  { %533 = vmatpush3.msra.mxu0 %v285_v7 }
 0x115   :  { %v430_v8 = vpop.f32.mrf.mxu0 }
 0x116   :  { %v280_v11 = vpop.f32.mrf.mxu1 }
 0x117   :  { %v431_v9 = vpop.f32.mrf.mxu0 }
 0x118   :  { %v432_v12 = vadd.f32 %v431_v9, %v430_v8  ;;  %v501_v13 = vpop.f32.mrf.mxu1 }
 0x11a   :  { %v211_v14 = vadd.f32 %v432_v12, %v396_v10 }
 0x11c   :  { %v281_v15 = vadd.f32 %v280_v11, %v211_v14 }
 0x11e   :  { %v284_v16 = vmax.f32 %v281_v15, 0.0 }
 0x120   :  { %535 = vmatmul.mubr.f32.vlgmr.msra.gmra.mxu0 %v284_v16 }
 0x1e0   :  { %v374_v0 = vpop.f32.mrf.mxu0 }
 0x1e1   :  { %v375_v18 = vadd.f32 %v397_v17, %v374_v0 }
 0x1e2   :  { %v536_v19 = vpop.f32.mrf.mxu0 }
 0x1e3   :  { %378 = vst [vmem:[#allocation11] sm:$0xff] %v375_v18 }
 0x1e4   :  { %637 = shalt.err (!%p634_p10)
}
 0x1e5   :  { %388 = dma.vmem_to_hbm [thread:$0]  %s386_s20, 128, %s770_s6, [#allocation5]  }
 0x1e6   :  { %652 = dma.done.wait [#allocation5], 128  }
 0x1e7   :  { %653 = vsyncadd [#allocation5], 4294967168 }
 0x1e8   :  { %392 = vsyncpa [#allocation4], 1 }
 0x1e9   :  { %393 = vsyncpa [#allocation7], 1 }
 0x1ea   :  { %394 = vsyncpa [#allocation10], 1 }
 0x1eb   :  { %395 = vsyncpa [#allocation5], 1 }

</bundles_post_ra>
